<compile_context>
chip_gen: v5e
topology: v5e:2x2
jax: 0.10.0
libtpu: 0.0.40
codegen_flags: <defaults>
</compile_context>

<pallas_src>
import functools

import jax
import jax.numpy as jnp
from jax.experimental import pallas as pl
from jax.experimental.pallas import tpu as pltpu


# ----------------------------- model hyper-params -----------------------------
H_PARAM = {
    "plasma_Plasma": {"hidden": 16, "flux_width": 8},
    "etch_Etch": {"n_grid": 8, "feature": 4, "hidden": 32, "mts_width": 4},
}
PROF_W = H_PARAM["etch_Etch"]["n_grid"] * H_PARAM["etch_Etch"]["feature"]   # 32
RCP_W = 9
FLUX_W = H_PARAM["plasma_Plasma"]["flux_width"]                             # 8
MTS_W = H_PARAM["etch_Etch"]["mts_width"]                                   # 4
PLASMA_HID = H_PARAM["plasma_Plasma"]["hidden"]                             # 16
ETCH_HID = H_PARAM["etch_Etch"]["hidden"]                                   # 32
ETCH_IN_W = PROF_W + FLUX_W + 1                                             # 41
ETCH_OUT_W = PROF_W + MTS_W                                                 # 36
X_WIDTH = PROF_W + 3 * RCP_W + 3                                            # 62
OUT_W = 3 * MTS_W + 3 * PROF_W + 3 * FLUX_W                                 # 132

# static column offsets of the packed input x (B, 62)
_X_RCP = [(PROF_W + i * RCP_W, PROF_W + (i + 1) * RCP_W) for i in range(3)]
_X_ET = [(PROF_W + 3 * RCP_W + i, PROF_W + 3 * RCP_W + i + 1) for i in range(3)]

# static column offsets of the packed output (B, 132): [mts x3 | prof x3 | flux x3]
_O_MTS = [(i * MTS_W, (i + 1) * MTS_W) for i in range(3)]
_O_PROF = [(3 * MTS_W + i * PROF_W, 3 * MTS_W + (i + 1) * PROF_W) for i in range(3)]
_O_FLUX = [(3 * MTS_W + 3 * PROF_W + i * FLUX_W,
            3 * MTS_W + 3 * PROF_W + (i + 1) * FLUX_W) for i in range(3)]


# --------------------------------- Pallas kernel ------------------------------
def fused_kernel(x_ref,
                 pw1_ref, pb1_ref, pw2_ref, pb2_ref,
                 ew1p_ref, ew1f_ref, ew1t_ref, eb1_ref, ew2_ref, eb2_ref,
                 out_ref):
    """All three (plasma + etch) stages, fully resident in VMEM / vregs."""
    x = x_ref[...]

    pw1 = pw1_ref[...]
    pb1 = pb1_ref[...]
    pw2 = pw2_ref[...]
    pb2 = pb2_ref[...]
    ew1p = ew1p_ref[...]   # (PROF_W, ETCH_HID) rows of ew1 for the prof columns
    ew1f = ew1f_ref[...]   # (FLUX_W, ETCH_HID) rows of ew1 for the flux columns
    ew1t = ew1t_ref[...]   # (1, ETCH_HID)      row of ew1 for the etch_time column
    eb1 = eb1_ref[...]
    ew2 = ew2_ref[...]
    eb2 = eb2_ref[...]

    def stage(prof, rcp, et):
        # Plasma MLP: flux = relu(rcp @ pw1 + pb1) @ pw2 + pb2
        h = jnp.maximum(
            jnp.dot(rcp, pw1, preferred_element_type=jnp.float32) + pb1, 0.0)
        flux = jnp.dot(h, pw2, preferred_element_type=jnp.float32) + pb2

        # Etch MLP layer 1 as split-weight partial matmuls (no lane-axis concat):
        #   concat(prof, flux, et) @ ew1  ==  prof@ew1p + flux@ew1f + et*ew1t
        h2 = (jnp.dot(prof, ew1p, preferred_element_type=jnp.float32)
              + jnp.dot(flux, ew1f, preferred_element_type=jnp.float32)
              + et * ew1t
              + eb1)
        h2 = jnp.maximum(h2, 0.0)
        out = jnp.dot(h2, ew2, preferred_element_type=jnp.float32) + eb2
        return flux, out[:, :PROF_W], out[:, PROF_W:]

    prof = x[:, 0:PROF_W]
    for s in range(3):
        r0, r1 = _X_RCP[s]
        t0, t1 = _X_ET[s]
        flux, prof, mts = stage(prof, x[:, r0:r1], x[:, t0:t1])
        m0, m1 = _O_MTS[s]
        p0, p1 = _O_PROF[s]
        f0, f1 = _O_FLUX[s]
        out_ref[:, m0:m1] = mts
        out_ref[:, p0:p1] = prof
        out_ref[:, f0:f1] = flux


# ------------------------------- full forward ---------------------------------
@jax.jit
def stwinner_forward(x, params):
    B = x.shape[0]
    b_pad = max(8, ((B + 7) // 8) * 8)        # sublane-align the batch dim
    if b_pad != B:
        x = jnp.pad(x, ((0, b_pad - B), (0, 0)))

    # Row-split the etch layer-1 weight once, at trace time (free).
    ew1 = params["ew1"]
    ew1p = ew1[:PROF_W]
    ew1f = ew1[PROF_W:PROF_W + FLUX_W]
    ew1t = ew1[PROF_W + FLUX_W:]

    # Pre-broadcast (1, H) bias rows so in-kernel bias adds are plain vadds.
    pb1 = jnp.broadcast_to(params["pb1"], (b_pad, PLASMA_HID))
    pb2 = jnp.broadcast_to(params["pb2"], (b_pad, FLUX_W))
    eb1 = jnp.broadcast_to(params["eb1"], (b_pad, ETCH_HID))
    eb2 = jnp.broadcast_to(params["eb2"], (b_pad, ETCH_OUT_W))

    vmem = pl.BlockSpec(memory_space=pltpu.MemorySpace.VMEM)
    out = pl.pallas_call(
        fused_kernel,
        out_shape=jax.ShapeDtypeStruct((b_pad, OUT_W), jnp.float32),
        in_specs=[vmem] * 11,
        out_specs=vmem,
    )(x,
      params["pw1"], pb1, params["pw2"], pb2,
      ew1p, ew1f, ew1t, eb1, params["ew2"], eb2)
    return out[:B]


# -------------------------- parameter init (deterministic) --------------------
def init_params(key):
    ks = jax.random.split(key, 8)

    def glorot(k, shape):
        fan_in, fan_out = shape
        lim = (6.0 / (fan_in + fan_out)) ** 0.5
        return jax.random.uniform(k, shape, jnp.float32, -lim, lim)

    return {
        # PlasmaModel: 9 -> PLASMA_HID -> FLUX_W
        "pw1": glorot(ks[0], (RCP_W, PLASMA_HID)),
        "pb1": jax.random.normal(ks[1], (1, PLASMA_HID), jnp.float32) * 0.01,
        "pw2": glorot(ks[2], (PLASMA_HID, FLUX_W)),
        "pb2": jax.random.normal(ks[3], (1, FLUX_W), jnp.float32) * 0.01,
        # EtchModel: ETCH_IN_W -> ETCH_HID -> ETCH_OUT_W
        "ew1": glorot(ks[4], (ETCH_IN_W, ETCH_HID)),
        "eb1": jax.random.normal(ks[5], (1, ETCH_HID), jnp.float32) * 0.01,
        "ew2": glorot(ks[6], (ETCH_HID, ETCH_OUT_W)),
        "eb2": jax.random.normal(ks[7], (1, ETCH_OUT_W), jnp.float32) * 0.01,
    }


# --------------------------- pure-JAX reference (check) -----------------------
def _stage_ref(prof_in, rcp, et, p):
    h = jnp.maximum(rcp @ p["pw1"] + p["pb1"], 0.0)
    flux = h @ p["pw2"] + p["pb2"]
    etch_in = jnp.concatenate([prof_in, flux, et], axis=1)
    h2 = jnp.maximum(etch_in @ p["ew1"] + p["eb1"], 0.0)
    out = h2 @ p["ew2"] + p["eb2"]
    return flux, out


def forward_ref(x, params):
    o = 0
    prof_in = x[:, o:o + PROF_W]; o += PROF_W
    rcps = [x[:, o + i * RCP_W: o + (i + 1) * RCP_W] for i in range(3)]
    o += 3 * RCP_W
    ets = [x[:, o + i: o + i + 1] for i in range(3)]

    flux_1, out_1 = _stage_ref(prof_in, rcps[0], ets[0], params)
    flux_2, out_2 = _stage_ref(out_1[:, :PROF_W], rcps[1], ets[1], params)
    flux_3, out_3 = _stage_ref(out_2[:, :PROF_W], rcps[2], ets[2], params)
    out_mts = jnp.concatenate((out_1[:, PROF_W:], out_2[:, PROF_W:], out_3[:, PROF_W:]), -1)
    out_prof = jnp.concatenate((out_1[:, :PROF_W], out_2[:, :PROF_W], out_3[:, :PROF_W]), -1)
    out_flux = jnp.concatenate((flux_1, flux_2, flux_3), -1)
    return jnp.concatenate((out_mts, out_prof, out_flux), -1)


# ------------------------------------ main -------------------------------------
if __name__ == "__main__":
    key = jax.random.PRNGKey(0)
    k_x, k_p = jax.random.split(key)

    B = 4
    x = jax.random.normal(k_x, (B, X_WIDTH), jnp.float32)
    params = init_params(k_p)

    out = stwinner_forward(x, params)
    out = jax.block_until_ready(out)

    ref = forward_ref(x, params)
    assert out.shape == (B, OUT_W), out.shape
    assert jnp.allclose(out, ref, atol=1e-4, rtol=1e-4), "mismatch vs JAX reference"

    print("KERNEL_OK")
</pallas_src>

<mosaic_0001>
module attributes {stable_mosaic.version = 11 : i64} {
  func.func @fused_kernel(%arg0: memref<8x62xf32, #tpu.memory_space<vmem>>, %arg1: memref<9x16xf32, #tpu.memory_space<vmem>>, %arg2: memref<8x16xf32, #tpu.memory_space<vmem>>, %arg3: memref<16x8xf32, #tpu.memory_space<vmem>>, %arg4: memref<8x8xf32, #tpu.memory_space<vmem>>, %arg5: memref<32x32xf32, #tpu.memory_space<vmem>>, %arg6: memref<8x32xf32, #tpu.memory_space<vmem>>, %arg7: memref<1x32xf32, #tpu.memory_space<vmem>>, %arg8: memref<8x32xf32, #tpu.memory_space<vmem>>, %arg9: memref<32x36xf32, #tpu.memory_space<vmem>>, %arg10: memref<8x36xf32, #tpu.memory_space<vmem>>, %arg11: memref<8x132xf32, #tpu.memory_space<vmem>>) attributes {dimension_semantics = [], scalar_prefetch = 0 : i64, scratch_operands = 0 : i64, tpu.core_type = #tpu.core_type<tc>} {
    %c0 = arith.constant 0 : index
    %c0_0 = arith.constant 0 : index
    %0 = vector.load %arg0[%c0, %c0_0] : memref<8x62xf32, #tpu.memory_space<vmem>>, vector<8x62xf32>
    %c0_1 = arith.constant 0 : index
    %c0_2 = arith.constant 0 : index
    %1 = vector.load %arg1[%c0_1, %c0_2] : memref<9x16xf32, #tpu.memory_space<vmem>>, vector<9x16xf32>
    %c0_3 = arith.constant 0 : index
    %c0_4 = arith.constant 0 : index
    %2 = vector.load %arg2[%c0_3, %c0_4] : memref<8x16xf32, #tpu.memory_space<vmem>>, vector<8x16xf32>
    %c0_5 = arith.constant 0 : index
    %c0_6 = arith.constant 0 : index
    %3 = vector.load %arg3[%c0_5, %c0_6] : memref<16x8xf32, #tpu.memory_space<vmem>>, vector<16x8xf32>
    %c0_7 = arith.constant 0 : index
    %c0_8 = arith.constant 0 : index
    %4 = vector.load %arg4[%c0_7, %c0_8] : memref<8x8xf32, #tpu.memory_space<vmem>>, vector<8x8xf32>
    %c0_9 = arith.constant 0 : index
    %c0_10 = arith.constant 0 : index
    %5 = vector.load %arg5[%c0_9, %c0_10] : memref<32x32xf32, #tpu.memory_space<vmem>>, vector<32x32xf32>
    %c0_11 = arith.constant 0 : index
    %c0_12 = arith.constant 0 : index
    %6 = vector.load %arg6[%c0_11, %c0_12] : memref<8x32xf32, #tpu.memory_space<vmem>>, vector<8x32xf32>
    %c0_13 = arith.constant 0 : index
    %c0_14 = arith.constant 0 : index
    %7 = vector.load %arg7[%c0_13, %c0_14] : memref<1x32xf32, #tpu.memory_space<vmem>>, vector<1x32xf32>
    %c0_15 = arith.constant 0 : index
    %c0_16 = arith.constant 0 : index
    %8 = vector.load %arg8[%c0_15, %c0_16] : memref<8x32xf32, #tpu.memory_space<vmem>>, vector<8x32xf32>
    %c0_17 = arith.constant 0 : index
    %c0_18 = arith.constant 0 : index
    %9 = vector.load %arg9[%c0_17, %c0_18] : memref<32x36xf32, #tpu.memory_space<vmem>>, vector<32x36xf32>
    %c0_19 = arith.constant 0 : index
    %c0_20 = arith.constant 0 : index
    %10 = vector.load %arg10[%c0_19, %c0_20] : memref<8x36xf32, #tpu.memory_space<vmem>>, vector<8x36xf32>
    %11 = vector.extract_strided_slice %0 {offsets = [0, 0], sizes = [8, 32], strides = [1, 1]} : vector<8x62xf32> to vector<8x32xf32>
    %12 = vector.extract_strided_slice %0 {offsets = [0, 32], sizes = [8, 9], strides = [1, 1]} : vector<8x62xf32> to vector<8x9xf32>
    %13 = vector.extract_strided_slice %0 {offsets = [0, 59], sizes = [8, 1], strides = [1, 1]} : vector<8x62xf32> to vector<8x1xf32>
    %cst = arith.constant dense<0.000000e+00> : vector<8x16xf32>
    %14 = tpu.matmul %12, %1, %cst {dimension_numbers = #tpu.dot_dimension_numbers<[1], [0], [0], [1], [0, 0, 1, 1], [], []>} : vector<8x9xf32>, vector<9x16xf32>, vector<8x16xf32> -> vector<8x16xf32>
    %15 = arith.addf %14, %2 : vector<8x16xf32>
    %cst_21 = arith.constant 0.000000e+00 : f32
    %16 = vector.broadcast %cst_21 : f32 to vector<8x16xf32>
    %17 = arith.maximumf %15, %16 : vector<8x16xf32>
    %cst_22 = arith.constant dense<0.000000e+00> : vector<8x8xf32>
    %18 = tpu.matmul %17, %3, %cst_22 {dimension_numbers = #tpu.dot_dimension_numbers<[1], [0], [0], [1], [0, 0, 1, 1], [], []>} : vector<8x16xf32>, vector<16x8xf32>, vector<8x8xf32> -> vector<8x8xf32>
    %19 = arith.addf %18, %4 : vector<8x8xf32>
    %cst_23 = arith.constant dense<0.000000e+00> : vector<8x32xf32>
    %20 = tpu.matmul %11, %5, %cst_23 {dimension_numbers = #tpu.dot_dimension_numbers<[1], [0], [0], [1], [0, 0, 1, 1], [], []>} : vector<8x32xf32>, vector<32x32xf32>, vector<8x32xf32> -> vector<8x32xf32>
    %cst_24 = arith.constant dense<0.000000e+00> : vector<8x32xf32>
    %21 = tpu.matmul %19, %6, %cst_24 {dimension_numbers = #tpu.dot_dimension_numbers<[1], [0], [0], [1], [0, 0, 1, 1], [], []>} : vector<8x8xf32>, vector<8x32xf32>, vector<8x32xf32> -> vector<8x32xf32>
    %22 = arith.addf %20, %21 : vector<8x32xf32>
    %23 = vector.broadcast %13 : vector<8x1xf32> to vector<8x32xf32>
    %24 = vector.broadcast %7 : vector<1x32xf32> to vector<8x32xf32>
    %25 = arith.mulf %23, %24 : vector<8x32xf32>
    %26 = arith.addf %22, %25 : vector<8x32xf32>
    %27 = arith.addf %26, %8 : vector<8x32xf32>
    %cst_25 = arith.constant 0.000000e+00 : f32
    %28 = vector.broadcast %cst_25 : f32 to vector<8x32xf32>
    %29 = arith.maximumf %27, %28 : vector<8x32xf32>
    %cst_26 = arith.constant dense<0.000000e+00> : vector<8x36xf32>
    %30 = tpu.matmul %29, %9, %cst_26 {dimension_numbers = #tpu.dot_dimension_numbers<[1], [0], [0], [1], [0, 0, 1, 1], [], []>} : vector<8x32xf32>, vector<32x36xf32>, vector<8x36xf32> -> vector<8x36xf32>
    %31 = arith.addf %30, %10 : vector<8x36xf32>
    %32 = vector.extract_strided_slice %31 {offsets = [0, 0], sizes = [8, 32], strides = [1, 1]} : vector<8x36xf32> to vector<8x32xf32>
    %33 = vector.extract_strided_slice %31 {offsets = [0, 32], sizes = [8, 4], strides = [1, 1]} : vector<8x36xf32> to vector<8x4xf32>
    %c0_27 = arith.constant 0 : index
    %c0_28 = arith.constant 0 : index
    %34 = vector.load %arg11[%c0_27, %c0_28] : memref<8x132xf32, #tpu.memory_space<vmem>>, vector<8x4xf32>
    tpu.vector_store %arg11[%c0_27, %c0_28], %33 {strides = array<i32>} : memref<8x132xf32, #tpu.memory_space<vmem>>, vector<8x4xf32>,
    %c0_29 = arith.constant 0 : index
    %c12 = arith.constant 12 : index
    %35 = vector.load %arg11[%c0_29, %c12] : memref<8x132xf32, #tpu.memory_space<vmem>>, vector<8x32xf32>
    tpu.vector_store %arg11[%c0_29, %c12], %32 {strides = array<i32>} : memref<8x132xf32, #tpu.memory_space<vmem>>, vector<8x32xf32>,
    %c0_30 = arith.constant 0 : index
    %c108 = arith.constant 108 : index
    %36 = vector.load %arg11[%c0_30, %c108] : memref<8x132xf32, #tpu.memory_space<vmem>>, vector<8x8xf32>
    tpu.vector_store %arg11[%c0_30, %c108], %19 {strides = array<i32>} : memref<8x132xf32, #tpu.memory_space<vmem>>, vector<8x8xf32>,
    %37 = vector.extract_strided_slice %0 {offsets = [0, 41], sizes = [8, 9], strides = [1, 1]} : vector<8x62xf32> to vector<8x9xf32>
    %38 = vector.extract_strided_slice %0 {offsets = [0, 60], sizes = [8, 1], strides = [1, 1]} : vector<8x62xf32> to vector<8x1xf32>
    %cst_31 = arith.constant dense<0.000000e+00> : vector<8x16xf32>
    %39 = tpu.matmul %37, %1, %cst_31 {dimension_numbers = #tpu.dot_dimension_numbers<[1], [0], [0], [1], [0, 0, 1, 1], [], []>} : vector<8x9xf32>, vector<9x16xf32>, vector<8x16xf32> -> vector<8x16xf32>
    %40 = arith.addf %39, %2 : vector<8x16xf32>
    %cst_32 = arith.constant 0.000000e+00 : f32
    %41 = vector.broadcast %cst_32 : f32 to vector<8x16xf32>
    %42 = arith.maximumf %40, %41 : vector<8x16xf32>
    %cst_33 = arith.constant dense<0.000000e+00> : vector<8x8xf32>
    %43 = tpu.matmul %42, %3, %cst_33 {dimension_numbers = #tpu.dot_dimension_numbers<[1], [0], [0], [1], [0, 0, 1, 1], [], []>} : vector<8x16xf32>, vector<16x8xf32>, vector<8x8xf32> -> vector<8x8xf32>
    %44 = arith.addf %43, %4 : vector<8x8xf32>
    %cst_34 = arith.constant dense<0.000000e+00> : vector<8x32xf32>
    %45 = tpu.matmul %32, %5, %cst_34 {dimension_numbers = #tpu.dot_dimension_numbers<[1], [0], [0], [1], [0, 0, 1, 1], [], []>} : vector<8x32xf32>, vector<32x32xf32>, vector<8x32xf32> -> vector<8x32xf32>
    %cst_35 = arith.constant dense<0.000000e+00> : vector<8x32xf32>
    %46 = tpu.matmul %44, %6, %cst_35 {dimension_numbers = #tpu.dot_dimension_numbers<[1], [0], [0], [1], [0, 0, 1, 1], [], []>} : vector<8x8xf32>, vector<8x32xf32>, vector<8x32xf32> -> vector<8x32xf32>
    %47 = arith.addf %45, %46 : vector<8x32xf32>
    %48 = vector.broadcast %38 : vector<8x1xf32> to vector<8x32xf32>
    %49 = vector.broadcast %7 : vector<1x32xf32> to vector<8x32xf32>
    %50 = arith.mulf %48, %49 : vector<8x32xf32>
    %51 = arith.addf %47, %50 : vector<8x32xf32>
    %52 = arith.addf %51, %8 : vector<8x32xf32>
    %cst_36 = arith.constant 0.000000e+00 : f32
    %53 = vector.broadcast %cst_36 : f32 to vector<8x32xf32>
    %54 = arith.maximumf %52, %53 : vector<8x32xf32>
    %cst_37 = arith.constant dense<0.000000e+00> : vector<8x36xf32>
    %55 = tpu.matmul %54, %9, %cst_37 {dimension_numbers = #tpu.dot_dimension_numbers<[1], [0], [0], [1], [0, 0, 1, 1], [], []>} : vector<8x32xf32>, vector<32x36xf32>, vector<8x36xf32> -> vector<8x36xf32>
    %56 = arith.addf %55, %10 : vector<8x36xf32>
    %57 = vector.extract_strided_slice %56 {offsets = [0, 0], sizes = [8, 32], strides = [1, 1]} : vector<8x36xf32> to vector<8x32xf32>
    %58 = vector.extract_strided_slice %56 {offsets = [0, 32], sizes = [8, 4], strides = [1, 1]} : vector<8x36xf32> to vector<8x4xf32>
    %c0_38 = arith.constant 0 : index
    %c4 = arith.constant 4 : index
    %59 = vector.load %arg11[%c0_38, %c4] : memref<8x132xf32, #tpu.memory_space<vmem>>, vector<8x4xf32>
    tpu.vector_store %arg11[%c0_38, %c4], %58 {strides = array<i32>} : memref<8x132xf32, #tpu.memory_space<vmem>>, vector<8x4xf32>,
    %c0_39 = arith.constant 0 : index
    %c44 = arith.constant 44 : index
    %60 = vector.load %arg11[%c0_39, %c44] : memref<8x132xf32, #tpu.memory_space<vmem>>, vector<8x32xf32>
    tpu.vector_store %arg11[%c0_39, %c44], %57 {strides = array<i32>} : memref<8x132xf32, #tpu.memory_space<vmem>>, vector<8x32xf32>,
    %c0_40 = arith.constant 0 : index
    %c116 = arith.constant 116 : index
    %61 = vector.load %arg11[%c0_40, %c116] : memref<8x132xf32, #tpu.memory_space<vmem>>, vector<8x8xf32>
    tpu.vector_store %arg11[%c0_40, %c116], %44 {strides = array<i32>} : memref<8x132xf32, #tpu.memory_space<vmem>>, vector<8x8xf32>,
    %62 = vector.extract_strided_slice %0 {offsets = [0, 50], sizes = [8, 9], strides = [1, 1]} : vector<8x62xf32> to vector<8x9xf32>
    %63 = vector.extract_strided_slice %0 {offsets = [0, 61], sizes = [8, 1], strides = [1, 1]} : vector<8x62xf32> to vector<8x1xf32>
    %cst_41 = arith.constant dense<0.000000e+00> : vector<8x16xf32>
    %64 = tpu.matmul %62, %1, %cst_41 {dimension_numbers = #tpu.dot_dimension_numbers<[1], [0], [0], [1], [0, 0, 1, 1], [], []>} : vector<8x9xf32>, vector<9x16xf32>, vector<8x16xf32> -> vector<8x16xf32>
    %65 = arith.addf %64, %2 : vector<8x16xf32>
    %cst_42 = arith.constant 0.000000e+00 : f32
    %66 = vector.broadcast %cst_42 : f32 to vector<8x16xf32>
    %67 = arith.maximumf %65, %66 : vector<8x16xf32>
    %cst_43 = arith.constant dense<0.000000e+00> : vector<8x8xf32>
    %68 = tpu.matmul %67, %3, %cst_43 {dimension_numbers = #tpu.dot_dimension_numbers<[1], [0], [0], [1], [0, 0, 1, 1], [], []>} : vector<8x16xf32>, vector<16x8xf32>, vector<8x8xf32> -> vector<8x8xf32>
    %69 = arith.addf %68, %4 : vector<8x8xf32>
    %cst_44 = arith.constant dense<0.000000e+00> : vector<8x32xf32>
    %70 = tpu.matmul %57, %5, %cst_44 {dimension_numbers = #tpu.dot_dimension_numbers<[1], [0], [0], [1], [0, 0, 1, 1], [], []>} : vector<8x32xf32>, vector<32x32xf32>, vector<8x32xf32> -> vector<8x32xf32>
    %cst_45 = arith.constant dense<0.000000e+00> : vector<8x32xf32>
    %71 = tpu.matmul %69, %6, %cst_45 {dimension_numbers = #tpu.dot_dimension_numbers<[1], [0], [0], [1], [0, 0, 1, 1], [], []>} : vector<8x8xf32>, vector<8x32xf32>, vector<8x32xf32> -> vector<8x32xf32>
    %72 = arith.addf %70, %71 : vector<8x32xf32>
    %73 = vector.broadcast %63 : vector<8x1xf32> to vector<8x32xf32>
    %74 = vector.broadcast %7 : vector<1x32xf32> to vector<8x32xf32>
    %75 = arith.mulf %73, %74 : vector<8x32xf32>
    %76 = arith.addf %72, %75 : vector<8x32xf32>
    %77 = arith.addf %76, %8 : vector<8x32xf32>
    %cst_46 = arith.constant 0.000000e+00 : f32
    %78 = vector.broadcast %cst_46 : f32 to vector<8x32xf32>
    %79 = arith.maximumf %77, %78 : vector<8x32xf32>
    %cst_47 = arith.constant dense<0.000000e+00> : vector<8x36xf32>
    %80 = tpu.matmul %79, %9, %cst_47 {dimension_numbers = #tpu.dot_dimension_numbers<[1], [0], [0], [1], [0, 0, 1, 1], [], []>} : vector<8x32xf32>, vector<32x36xf32>, vector<8x36xf32> -> vector<8x36xf32>
    %81 = arith.addf %80, %10 : vector<8x36xf32>
    %82 = vector.extract_strided_slice %81 {offsets = [0, 0], sizes = [8, 32], strides = [1, 1]} : vector<8x36xf32> to vector<8x32xf32>
    %83 = vector.extract_strided_slice %81 {offsets = [0, 32], sizes = [8, 4], strides = [1, 1]} : vector<8x36xf32> to vector<8x4xf32>
    %c0_48 = arith.constant 0 : index
    %c8 = arith.constant 8 : index
    %84 = vector.load %arg11[%c0_48, %c8] : memref<8x132xf32, #tpu.memory_space<vmem>>, vector<8x4xf32>
    tpu.vector_store %arg11[%c0_48, %c8], %83 {strides = array<i32>} : memref<8x132xf32, #tpu.memory_space<vmem>>, vector<8x4xf32>,
    %c0_49 = arith.constant 0 : index
    %c76 = arith.constant 76 : index
    %85 = vector.load %arg11[%c0_49, %c76] : memref<8x132xf32, #tpu.memory_space<vmem>>, vector<8x32xf32>
    tpu.vector_store %arg11[%c0_49, %c76], %82 {strides = array<i32>} : memref<8x132xf32, #tpu.memory_space<vmem>>, vector<8x32xf32>,
    %c0_50 = arith.constant 0 : index
    %c124 = arith.constant 124 : index
    %86 = vector.load %arg11[%c0_50, %c124] : memref<8x132xf32, #tpu.memory_space<vmem>>, vector<8x8xf32>
    tpu.vector_store %arg11[%c0_50, %c124], %69 {strides = array<i32>} : memref<8x132xf32, #tpu.memory_space<vmem>>, vector<8x8xf32>,
    return
  }
}

</mosaic_0001>

<bundles_post_ra>
// kernel: stwinner_forward.1
= control target key start
LH: loop header
LB: loop body
LE: loop exit
PB: predicated region body
PF: predicated region fallthrough
CT: control target
= control target key end

     0   :  { %vm63_vm0 = vcmask 1040384   ;;  %s531_s23 = smov 96   ;;  %vm60_vm1 = vcmask 72704   ;;  %v533_v8 = vmov 60   ;;  %v534_v9 = vmov 61   ;;  %s536_s18 = smov 108   ;;  %s763_s0 = inlined_call_operand.vmem [shape: f32[8,62], index: 0, kind: input, shape index: {}]   ;;  %s764_s1 = inlined_call_operand.vmem [shape: f32[9,16], index: 1, kind: input, shape index: {}]   ;;  %s765_s3 = inlined_call_operand.vmem [shape: f32[16,8], index: 3, kind: input, shape index: {}]   ;;  %s766_s5 = inlined_call_operand.vmem [shape: f32[32,32], index: 5, kind: input, shape index: {}]   ;;  %s767_s2 = inlined_call_operand.vmem [shape: f32[8,16], index: 2, kind: input, shape index: {}]   ;;  %s768_s7 = inlined_call_operand.vmem [shape: f32[1,32], index: 7, kind: input, shape index: {}]   ;;  %s769_s6 = inlined_call_operand.vmem [shape: f32[8,32], index: 6, kind: input, shape index: {}]   ;;  %s770_s4 = inlined_call_operand.vmem [shape: f32[8,8], index: 4, kind: input, shape index: {}]   ;;  %s771_s9 = inlined_call_operand.vmem [shape: f32[32,36], index: 9, kind: input, shape index: {}]   ;;  %s772_s8 = inlined_call_operand.vmem [shape: f32[8,32], index: 8, kind: input, shape index: {}]   ;;  %s773_s10 = inlined_call_operand.vmem [shape: f32[8,36], index: 10, kind: input, shape index: {}]   ;;  %s774_s11 = inlined_call_operand.vmem [shape: f32[8,132], index: 11, kind: output, shape index: {}]  }
   0x1   :  { %v608_v0 = vld [vmem:[%s763_s0] sm:$0xff]  ;;  %v40_v1 = vld [vmem:[%s764_s1 + $0x8] sm:$0x1]  ;;  %s532_s0 = smov 87   ;;  %v631_v6 = vld [vmem:[%s766_s5 + $0x18] sm:$0xff]  ;;  %527 = vset.pattern.permute.xlu2 %v533_v8  ;;  %529 = vset.pattern.permute.xlu0 %v534_v9  ;;  %vm88_vm2 = vcmask 130048  }
   0x2   :  { %v39_v2 = vld [vmem:[%s764_s1] sm:$0xff]  ;;  %58 = vrot.lane.b32.xlu0 %v608_v0, %s531_s23  ;;  %494 = vmatpush.msk.msra.mxu0 %vm63_vm0, %v40_v1  ;;  %v43_v4 = vld [vmem:[%s765_s3 + $0x8] sm:$0xff]  ;;  %v636_v7 = vld [vmem:[%s766_s5 + $0x10] sm:$0xff]  ;;  %vm136_vm3 = vcmask 261120   ;;  %v535_v18 = vmov 59   ;;  %vm112_vm4 = vcmask 64512  }
   0x3   :  { %106 = vmatpush.msra.mxu1 %v43_v4  ;;  %v42_v5 = vld [vmem:[%s765_s3] sm:$0xff]  ;;  %151 = vmatpush.msra.mxu3 %v631_v6  ;;  %v46_v14 = vld [vmem:[%s766_s5 + $0x8] sm:$0xff]  ;;  %s537_s19 = smov 78   ;;  %v55_v22 = vld [vmem:[%s771_s9 + $0x18] sm:$0xff]  ;;  %vm197_vm5 = vcmask 31744   ;;  %vm202_vm6 = vcmask 359520  }
   0x4   :  { %82 = vmatpush.msra.mxu0 %v39_v2  ;;  %303 = vperm.xlu2 %527, %v608_v0   ;;  %v645_v10 = vld [vmem:[%s767_s2] sm:$0xff]  ;;  %v54_v23 = vld [vmem:[%s771_s9 + $0x10] sm:$0xff]  ;;  %v53_v24 = vld [vmem:[%s771_s9 + $0x8] sm:$0xff]  ;;  %vm207_vm7 = vcmask 950112   ;;  %s540_s15 = smov 124   ;;  %s541_s16 = smov 44  }
   0x5   :  { %107 = vmatpush.msra.mxu1 %v42_v5  ;;  %152 = vmatpush.msra.mxu3 %v636_v7  ;;  %v656_v15 = vld [vmem:[%s769_s6] sm:$0xff]  ;;  %s542_s2 = smov 100   ;;  %vm337_vm8 = vcmask 64544   ;;  %vm342_vm9 = vcmask 621920   ;;  %vm347_vm10 = vcmask 1015712   ;;  %vm477_vm11 = vcmask 97344  }
   0x6   :  { %500 = vmatpush.msk.msrb.mxu0 %vm63_vm0, %v40_v1  ;;  %v45_v16 = vld [vmem:[%s766_s5] sm:$0xff]  ;;  %131 = vmatpush.msra.mxu2 %v656_v15  ;;  %vm482_vm12 = vcmask 884320   ;;  %vm487_vm13 = vcmask 1048544  }
   0x7   :  { %251 = vmatpush.msrb.mxu1 %v43_v4  ;;  %153 = vmatpush.msra.mxu3 %v46_v14  ;;  %v670_v19 = vld [vmem:[%s770_s4] sm:$0xff]  ;;  %s543_s4 = smov 76  }
   0x8   :  { %228 = vmatpush.msrb.mxu0 %v39_v2  ;;  %526 = vset.pattern.permute.xlu1 %v535_v18  ;;  %v52_v25 = vld [vmem:[%s771_s9] sm:$0xff] }
   0x9   :  { %252 = vmatpush.msrb.mxu1 %v42_v5  ;;  %154 = vmatpush.msra.mxu3 %v45_v16  ;;  %v696_v30 = vld [vmem:[%s768_s7] ss:$0 sm:$0xff]  ;;  %s538_s7 = smov 116  }
   0xa   :  { %209 = vrot.lane.b32.xlu0 %v608_v0, %s532_s0  ;;  %498 = vmatmul.msk.f32.vlgmr.msra.gmra.mxu3 %vm136_vm3, %v608_v0  ;;  %v703_v36 = vld [vmem:[%s772_s8] sm:$0xff]  ;;  %s539_s8 = smov 12   ;;  %s544_s0 = smov 104  }
   0xb   :  { %160 = vperm.xlu1 %526, %v608_v0   ;;  %275 = vmatpush.msrb.mxu3 %v656_v15  ;;  %v713_v42 = vld [vmem:[%s773_s10] sm:$0xff] }
   0xc   :  { %528 = vset.pattern.permute.xlu2 %v534_v9  ;;  %185 = vmatpush.msrb.mxu2 %v55_v22 }
   0xd   :  { %443 = vperm.xlu2 %528, %v608_v0   ;;  %391 = vmatpush.msra.mxu3 %v43_v4 }
   0xe   :  { %186 = vmatpush.msrb.mxu2 %v54_v23 }
   0xf   :  { %392 = vmatpush.msra.mxu3 %v42_v5 }
  0x10   :  { %187 = vmatpush.msrb.mxu2 %v53_v24 }
  0x12   :  { %188 = vmatpush.msrb.mxu2 %v52_v25 }
  0x13   :  { %349 = vrot.lane.b32.xlu1 %v608_v0, %s537_s19 }
  0x5e   :  { %v304_v48 = vpop.permute.xlu2 %303 }
  0x5f   :  { %v306_v54 = vmul.f32 %v696_v30, %v304_v48 }
  0x67   :  { %v444_v49 = vpop.permute.xlu2 %443 }
  0x68   :  { %v446_v5 = vmul.f32 %v696_v30, %v444_v49 }
  0x74   :  { %v59_v3 = vpop.permute.xlu0 %58 }
  0x75   :  { %495 = vmatmul.msk.f32.vlgmr.msra.gmra.mxu0 %vm60_vm1, %v59_v3 }
  0x76   :  { %325 = vmatpush.msra.mxu0 %v55_v22 }
  0x78   :  { %326 = vmatpush.msra.mxu0 %v54_v23 }
  0x7a   :  { %327 = vmatpush.msra.mxu0 %v53_v24 }
  0x7c   :  { %v210_v17 = vpop.permute.xlu0 %209  ;;  %328 = vmatpush.msra.mxu0 %v52_v25 }
  0x7d   :  { %501 = vmatmul.msk.f32.vlgmr.msrb.gmra.mxu0 %vm60_vm1, %v210_v17  ;;  %v161_v29 = vpop.permute.xlu1 %160 }
  0x7e   :  { %434 = vmatpush.msrb.mxu0 %v631_v6  ;;  %v166_v33 = vmul.f32 %v696_v30, %v161_v29 }
  0x80   :  { %435 = vmatpush.msrb.mxu0 %v636_v7 }
  0x82   :  { %436 = vmatpush.msrb.mxu0 %v46_v14 }
  0x84   :  { %437 = vmatpush.msrb.mxu0 %v45_v16 }
  0x85   :  { %v350_v31 = vpop.permute.xlu1 %349 }
  0x8d   :  { %v156_v32 = vpop.f32.mrf.mxu3 }
  0xf2   :  { %v84_v11 = vpop.f32.mrf.mxu0 }
  0xf3   :  { %v85_v12 = vadd.f32 %v84_v11, %v645_v10 }
  0xf5   :  { %v87_v13 = vmax.f32 %v85_v12, 0.0 }
  0xf7   :  { %496 = vmatmul.msk.f32.vlgmr.msra.gmra.mxu1 %vm88_vm2, %v87_v13 }
  0xf8   :  { %506 = vmatpush.msk.msra.mxu1 %vm63_vm0, %v40_v1 }
  0xfa   :  { %368 = vmatpush.msra.mxu1 %v39_v2  ;;  %v230_v26 = vpop.f32.mrf.mxu0 }
  0xfb   :  { %v231_v27 = vadd.f32 %v230_v26, %v645_v10 }
  0xfd   :  { %v233_v28 = vmax.f32 %v231_v27, 0.0 }
  0xff   :  { %502 = vmatmul.msk.f32.vlgmr.msrb.gmra.mxu1 %vm88_vm2, %v233_v28 }
 0x100   :  { %465 = vmatpush.msrb.mxu1 %v55_v22 }
 0x102   :  { %466 = vmatpush.msrb.mxu1 %v54_v23 }
 0x104   :  { %467 = vmatpush.msrb.mxu1 %v53_v24 }
 0x106   :  { %468 = vmatpush.msrb.mxu1 %v52_v25 }
 0x107   :  { %507 = vmatmul.msk.f32.vlgmr.msra.gmra.mxu1 %vm60_vm1, %v350_v31 }
 0x174   :  { %v109_v20 = vpop.f32.mrf.mxu1 }
 0x175   :  { %v110_v21 = vadd.f32 %v109_v20, %v670_v19 }
 0x177   :  { %204 = vrot.lane.b32.xlu2 %v110_v21, %s536_s18  ;;  %497 = vmatmul.msk.f32.vlgmr.msra.gmra.mxu2 %vm112_vm4, %v110_v21 }
 0x178   :  { %294 = vmatpush.msra.mxu2 %v631_v6 }
 0x17a   :  { %295 = vmatpush.msra.mxu2 %v636_v7 }
 0x17c   :  { %296 = vmatpush.msra.mxu2 %v46_v14  ;;  %v254_v40 = vpop.f32.mrf.mxu1 }
 0x17d   :  { %v255_v41 = vadd.f32 %v254_v40, %v670_v19 }
 0x17e   :  { %297 = vmatpush.msra.mxu2 %v45_v16 }
 0x17f   :  { %344 = vrot.lane.b32.xlu2 %v255_v41, %s538_s7  ;;  %503 = vmatmul.msk.f32.vlgmr.msrb.gmra.mxu3 %vm112_vm4, %v255_v41 }
 0x184   :  { %v370_v45 = vpop.f32.mrf.mxu1 }
 0x185   :  { %v371_v46 = vadd.f32 %v370_v45, %v645_v10 }
 0x187   :  { %v373_v47 = vmax.f32 %v371_v46, 0.0 }
 0x189   :  { %508 = vmatmul.msk.f32.vlgmr.msra.gmra.mxu3 %vm88_vm2, %v373_v47 }
 0x1d1   :  { %v205_v52 = vpop.permute.xlu2 %204 }
 0x1d9   :  { %v345_v0 = vpop.permute.xlu2 %344 }
 0x1fa   :  { %v133_v34 = vpop.f32.mrf.mxu2 }
 0x1fb   :  { %v157_v35 = vadd.f32 %v156_v32, %v133_v34 }
 0x1fd   :  { %v167_v37 = vadd.f32 %v166_v33, %v157_v35 }
 0x1ff   :  { %v168_v38 = vadd.f32 %v167_v37, %v703_v36 }
 0x201   :  { %v169_v39 = vmax.f32 %v168_v38, 0.0 }
 0x202   :  { %v277_v53 = vpop.f32.mrf.mxu3 }
 0x203   :  { %499 = vmatmul.msk.f32.vlgmr.msrb.gmra.mxu2 %vm136_vm3, %v169_v39 }
 0x204   :  { %415 = vmatpush.msrb.mxu2 %v656_v15 }
 0x20c   :  { %v394_v60 = vpop.f32.mrf.mxu3 }
 0x20d   :  { %v395_v61 = vadd.f32 %v394_v60, %v670_v19 }
 0x20f   :  { %484 = vrot.lane.b32.xlu2 %v395_v61, %s540_s15 }
 0x269   :  { %v485_v1 = vpop.permute.xlu2 %484 }
 0x26a   :  { %489 = vst.msk [vmem:[%s774_s11 + $0x8] sm:$0xff] %vm197_vm5, %v485_v1 }
 0x286   :  { %v190_v43 = vpop.f32.mrf.mxu2 }
 0x287   :  { %v191_v44 = vadd.f32 %v190_v43, %v713_v42 }
 0x289   :  { %199 = vrot.lane.b32.xlu1 %v191_v44, %s539_s8  ;;  %194 = vrot.lane.b32.xlu0 %v191_v44, %s531_s23 }
 0x28a   :  { %504 = vmatmul.msk.f32.vlgmr.msra.gmra.mxu2 %vm136_vm3, %v191_v44 }
 0x292   :  { %509 = vmatmul.msk.f32.vlgmr.msrb.gmra.mxu2 %vm112_vm4, %v395_v61 }
 0x2fb   :  { %v200_v50 = vpop.permute.xlu1 %199  ;;  %v195_v51 = vpop.permute.xlu0 %194 }
 0x2fc   :  { %198 = vst.msk [vmem:[%s774_s11] sm:$0xff] %vm197_vm5, %v195_v51 }
 0x2fd   :  { %203 = vst.msk [vmem:[%s774_s11] sm:$0xff] %vm202_vm6, %v200_v50 }
 0x2fe   :  { %208 = vst.msk [vmem:[%s774_s11] sm:$0xff] %vm207_vm7, %v205_v52 }
 0x30d   :  { %v299_v55 = vpop.f32.mrf.mxu2 }
 0x30e   :  { %v300_v56 = vadd.f32 %v299_v55, %v277_v53 }
 0x310   :  { %v307_v57 = vadd.f32 %v306_v54, %v300_v56 }
 0x312   :  { %v308_v58 = vadd.f32 %v307_v57, %v703_v36 }
 0x314   :  { %v309_v59 = vmax.f32 %v308_v58, 0.0 }
 0x315   :  { %v417_v4 = vpop.f32.mrf.mxu2 }
 0x316   :  { %505 = vmatmul.msk.f32.vlgmr.msra.gmra.mxu0 %vm136_vm3, %v309_v59 }
 0x393   :  { %v330_v62 = vpop.f32.mrf.mxu0 }
 0x394   :  { %v331_v63 = vadd.f32 %v330_v62, %v713_v42 }
 0x396   :  { %339 = vrot.lane.b32.xlu1 %v331_v63, %s541_s16  ;;  %334 = vrot.lane.b32.xlu0 %v331_v63, %s542_s2 }
 0x397   :  { %510 = vmatmul.msk.f32.vlgmr.msrb.gmra.mxu0 %vm136_vm3, %v331_v63 }
 0x408   :  { %v340_v2 = vpop.permute.xlu1 %339  ;;  %v335_v3 = vpop.permute.xlu0 %334 }
 0x409   :  { %338 = vst.msk [vmem:[%s774_s11] sm:$0xff] %vm337_vm8, %v335_v3 }
 0x40a   :  { %343 = vst.msk [vmem:[%s774_s11] sm:$0xff] %vm342_vm9, %v340_v2 }
 0x40b   :  { %348 = vst.msk [vmem:[%s774_s11] sm:$0xff] %vm347_vm10, %v345_v0 }
 0x414   :  { %v439_v6 = vpop.f32.mrf.mxu0 }
 0x415   :  { %v440_v7 = vadd.f32 %v439_v6, %v417_v4 }
 0x417   :  { %v447_v8 = vadd.f32 %v446_v5, %v440_v7 }
 0x419   :  { %v448_v9 = vadd.f32 %v447_v8, %v703_v36 }
 0x41b   :  { %v449_v10 = vmax.f32 %v448_v9, 0.0 }
 0x41d   :  { %511 = vmatmul.msk.f32.vlgmr.msrb.gmra.mxu1 %vm136_vm3, %v449_v10 }
 0x49a   :  { %v470_v11 = vpop.f32.mrf.mxu1 }
 0x49b   :  { %v471_v12 = vadd.f32 %v470_v11, %v713_v42 }
 0x49d   :  { %479 = vrot.lane.b32.xlu1 %v471_v12, %s543_s4  ;;  %474 = vrot.lane.b32.xlu0 %v471_v12, %s544_s0 }
 0x50f   :  { %v480_v13 = vpop.permute.xlu1 %479  ;;  %v475_v14 = vpop.permute.xlu0 %474 }
 0x510   :  { %478 = vst.msk [vmem:[%s774_s11] sm:$0xff] %vm477_vm11, %v475_v14 }
 0x511   :  { %483 = vst.msk [vmem:[%s774_s11] sm:$0xff] %vm482_vm12, %v480_v13 }
 0x512   :  { %488 = vst.msk [vmem:[%s774_s11] sm:$0xff] %vm487_vm13, %v485_v1 }

</bundles_post_ra>
